<compile_context>
chip_gen: v7x
topology: tpu7x:2x2x1
jax: 0.10.0
libtpu: 0.0.40
codegen_flags: <defaults>
</compile_context>

<pallas_src>
import jax
import jax.numpy as jnp
from jax.experimental import pallas as pl
from jax.experimental.pallas import tpu as pltpu

_SOFTPLUS_THRESHOLD = 20.0  # matches torch.nn.Softplus default (beta=1, threshold=20)
_LANES = 128


def _softplus_kernel(x_ref, y_ref, z_ref):
    # Cast to f32 for compute (no-op for f32; keeps v5e VPU/EUP on their 32-bit path).
    x = x_ref[...].astype(jnp.float32)
    # Shared stable-softplus form:
    #   L = log1p(exp(-|x|));  softplus(x) = max(x, 0) + L;  softplus(-x) = max(-x, 0) + L
    # and -log(-expm1(-softplus(x))) == softplus(-x) algebraically, so z needs no y.
    ell = jnp.log1p(jnp.exp(-jnp.abs(x)))
    y = jnp.maximum(x, 0.0) + ell
    # Preserve torch threshold semantics: y == x exactly for x > 20.
    y = jnp.where(x > _SOFTPLUS_THRESHOLD, x, y)
    # z intentionally not gated by the threshold branch: for x > 20 the gate would
    # change z by < f32 eps, so this matches torch within rounding.
    z = jnp.maximum(-x, 0.0) + ell
    y_ref[...] = y.astype(y_ref.dtype)
    z_ref[...] = z.astype(z_ref.dtype)


def _round_up(n, m):
    return ((n + m - 1) // m) * m


def softplus_layer(x, *, tile_rows=4096):
    """Pallas SoftplusLayer.forward: returns (softplus(x), -log(-expm1(-softplus(x))))."""
    orig_shape = x.shape
    orig_dtype = x.dtype
    total = x.size
    itemsize = jnp.dtype(orig_dtype).itemsize

    # Sublane packing granularity: 8 rows for 4-byte dtypes, 16 for 2-byte, 32 for 1-byte.
    pack = max(1, 4 // itemsize)
    sub = 8 * pack
    # Scale the row cap so blocks stay ~2 MiB regardless of dtype width.
    tr_cap = tile_rows * pack

    rows = pl.cdiv(total, _LANES)

    if rows <= sub:
        # Tiny input: block == full array (explicitly allowed by the (8,128) rule).
        tr = rows
    else:
        # Block rows: multiple of the sublane pack, capped at ~2 MiB blocks.
        tr = min(tr_cap, (rows // sub) * sub)
        # Keep at least 2 grid steps so a v7x megacore split has work for both cores.
        if rows >= 2 * sub:
            tr = min(tr, _round_up(pl.cdiv(rows, 2), sub))
    grid_rows = pl.cdiv(rows, tr)  # partial final block handled by Pallas masking

    padded = rows * _LANES
    x_flat = jnp.ravel(x)
    if padded != total:
        # Only pad to the 128-lane boundary (<=127 elements).
        # TODO(synk): if non-128-divisible element counts are hot, move this ragged
        # tail in-kernel (pl.ANY + make_async_copy + masked tail store) to drop the
        # pad/slice HBM passes entirely.
        x_flat = jnp.pad(x_flat, (0, padded - total))
    x2d = x_flat.reshape(rows, _LANES)

    block = pl.BlockSpec((tr, _LANES), lambda i: (i, 0))

    # 1 input + 2 outputs, double-buffered -> 6 blocks; add headroom, cap for v7x (64 MiB).
    block_bytes = tr * _LANES * itemsize
    vmem_limit = min(max(32 << 20, 6 * block_bytes + (16 << 20)), 64 << 20)

    y2d, z2d = pl.pallas_call(
        _softplus_kernel,
        out_shape=(
            jax.ShapeDtypeStruct((rows, _LANES), orig_dtype),
            jax.ShapeDtypeStruct((rows, _LANES), orig_dtype),
        ),
        grid_spec=pltpu.PrefetchScalarGridSpec(
            num_scalar_prefetch=0,
            grid=(grid_rows,),
            in_specs=[block],
            out_specs=(block, block),
        ),
        compiler_params=pltpu.CompilerParams(
            # Single parallel axis; on v7x consider pltpu.CORE_PARALLEL if xprof
            # shows one TensorCore idle. No-op on single-TC v5e/v6e.
            dimension_semantics=("parallel",),
            vmem_limit_bytes=vmem_limit,
        ),
    )(x2d)

    if padded == total:
        # 128-aligned element count: zero-copy reshape back (works for any row count,
        # including rows not a multiple of the tile, thanks to partial blocks).
        y = y2d.reshape(orig_shape)
        z = z2d.reshape(orig_shape)
    else:
        # Ragged tail: drop the <=127 padded elements.
        y = y2d.reshape(-1)[:total].reshape(orig_shape)
        z = z2d.reshape(-1)[:total].reshape(orig_shape)
    return y, z


def _reference(x):
    # Numerically stable reference (the naive chained -log(-expm1(-y)) overflows for x << 0).
    x = x.astype(jnp.float32)
    ell = jnp.log1p(jnp.exp(-jnp.abs(x)))
    y = jnp.where(x > _SOFTPLUS_THRESHOLD, x, jnp.maximum(x, 0.0) + ell)
    z = jnp.maximum(-x, 0.0) + ell
    return y, z


if __name__ == "__main__":
    key = jax.random.PRNGKey(0)
    # Small NCHW input consistent with an elementwise module (2048 elems, 128-aligned).
    x = jax.random.normal(key, (2, 4, 16, 16), dtype=jnp.float32) * 3.0
    y, z = softplus_layer(x)
    jax.block_until_ready((y, z))
    y_ref, z_ref = _reference(x)
    assert y.shape == x.shape and z.shape == x.shape
    assert jnp.allclose(y, y_ref, atol=1e-5, rtol=1e-5)
    assert jnp.allclose(z, z_ref, atol=1e-5, rtol=1e-5)

    # 128-aligned total whose row count is NOT a multiple of the tile:
    # exercises the partial-final-block path (zero-copy, no pad/slice).
    x1 = jax.random.normal(jax.random.PRNGKey(2), (3, 4, 8, 16), dtype=jnp.float32) * 2.0
    y1, z1 = softplus_layer(x1)
    jax.block_until_ready((y1, z1))
    y1_ref, z1_ref = _reference(x1)
    assert jnp.allclose(y1, y1_ref, atol=1e-5, rtol=1e-5)
    assert jnp.allclose(z1, z1_ref, atol=1e-5, rtol=1e-5)

    # Non-128-aligned element count exercises the (<=127-element) padding path.
    x2 = jax.random.normal(jax.random.PRNGKey(1), (3, 5, 7, 11), dtype=jnp.float32) * 5.0
    y2, z2 = softplus_layer(x2)
    jax.block_until_ready((y2, z2))
    y2_ref, z2_ref = _reference(x2)
    assert jnp.allclose(y2, y2_ref, atol=1e-5, rtol=1e-5)
    assert jnp.allclose(z2, z2_ref, atol=1e-5, rtol=1e-5)

    # Extreme values stay finite (stable form; the chained torch formulation gives +inf).
    x3 = jnp.array([[-100.0, -30.0, -1.0, 0.0, 1.0, 30.0, 100.0, 20.5]] * 16,
                   dtype=jnp.float32)
    y3, z3 = softplus_layer(x3)
    jax.block_until_ready((y3, z3))
    assert bool(jnp.all(jnp.isfinite(y3))) and bool(jnp.all(jnp.isfinite(z3)))

    # bf16 path (tile_rows auto-scaled x2, bf16 outputs).
    x4 = jax.random.normal(jax.random.PRNGKey(3), (4, 64, 128), dtype=jnp.bfloat16) * 3.0
    y4, z4 = softplus_layer(x4)
    jax.block_until_ready((y4, z4))
    y4_ref, z4_ref = _reference(x4)
    assert jnp.allclose(y4.astype(jnp.float32), y4_ref, atol=2e-2, rtol=2e-2)
    assert jnp.allclose(z4.astype(jnp.float32), z4_ref, atol=2e-2, rtol=2e-2)

    print("KERNEL_OK")
</pallas_src>

<mosaic_0001>
module attributes {stable_mosaic.version = 11 : i64} {
  func.func @_softplus_kernel(%arg0: i32, %arg1: memref<8x128xf32, #tpu.memory_space<vmem>>, %arg2: memref<8x128xf32, #tpu.memory_space<vmem>>, %arg3: memref<8x128xf32, #tpu.memory_space<vmem>>) attributes {dimension_semantics = [#tpu.dimension_semantics<parallel>], iteration_bounds = array<i64: 2>, scalar_prefetch = 0 : i64, scratch_operands = 0 : i64, tpu.core_type = #tpu.core_type<tc>, window_params = [{transform_indices = @transform_0, window_bounds = array<i64: 8, 128>}, {transform_indices = @transform_1, window_bounds = array<i64: 8, 128>}, {transform_indices = @transform_2, window_bounds = array<i64: 8, 128>}]} {
    %c0 = arith.constant 0 : index
    %c0_0 = arith.constant 0 : index
    %0 = vector.load %arg1[%c0, %c0_0] : memref<8x128xf32, #tpu.memory_space<vmem>>, vector<8x128xf32>
    %1 = math.absf %0 : vector<8x128xf32>
    %cst = arith.constant 0.000000e+00 : f32
    %2 = vector.broadcast %cst : f32 to vector<8x128xf32>
    %3 = arith.subf %2, %1 : vector<8x128xf32>
    %4 = math.exp %3 : vector<8x128xf32>
    %5 = math.log1p %4 : vector<8x128xf32>
    %cst_1 = arith.constant 0.000000e+00 : f32
    %6 = vector.broadcast %cst_1 : f32 to vector<8x128xf32>
    %7 = arith.maximumf %0, %6 : vector<8x128xf32>
    %8 = arith.addf %7, %5 : vector<8x128xf32>
    %cst_2 = arith.constant 2.000000e+01 : f32
    %9 = vector.broadcast %cst_2 : f32 to vector<8x128xf32>
    %10 = arith.cmpf ogt, %0, %9 : vector<8x128xf32>
    %11 = arith.select %10, %0, %8 : vector<8x128xi1>, vector<8x128xf32>
    %cst_3 = arith.constant 0.000000e+00 : f32
    %12 = vector.broadcast %cst_3 : f32 to vector<8x128xf32>
    %13 = arith.subf %12, %0 : vector<8x128xf32>
    %cst_4 = arith.constant 0.000000e+00 : f32
    %14 = vector.broadcast %cst_4 : f32 to vector<8x128xf32>
    %15 = arith.maximumf %13, %14 : vector<8x128xf32>
    %16 = arith.addf %15, %5 : vector<8x128xf32>
    %c0_5 = arith.constant 0 : index
    %c0_6 = arith.constant 0 : index
    %17 = vector.load %arg2[%c0_5, %c0_6] : memref<8x128xf32, #tpu.memory_space<vmem>>, vector<8x128xf32>
    tpu.vector_store %arg2[%c0_5, %c0_6], %11 {strides = array<i32>} : memref<8x128xf32, #tpu.memory_space<vmem>>, vector<8x128xf32>,
    %c0_7 = arith.constant 0 : index
    %c0_8 = arith.constant 0 : index
    %18 = vector.load %arg3[%c0_7, %c0_8] : memref<8x128xf32, #tpu.memory_space<vmem>>, vector<8x128xf32>
    tpu.vector_store %arg3[%c0_7, %c0_8], %16 {strides = array<i32>} : memref<8x128xf32, #tpu.memory_space<vmem>>, vector<8x128xf32>,
    return
  }
  func.func @transform_0(%arg0: i32) -> (i32, i32) {
    %c0_i32 = arith.constant 0 : i32
    %c0_i32_0 = arith.constant 0 : i32
    return %arg0, %c0_i32 : i32, i32
  }
  func.func @transform_1(%arg0: i32) -> (i32, i32) {
    %c0_i32 = arith.constant 0 : i32
    %c0_i32_0 = arith.constant 0 : i32
    return %arg0, %c0_i32 : i32, i32
  }
  func.func @transform_2(%arg0: i32) -> (i32, i32) {
    %c0_i32 = arith.constant 0 : i32
    %c0_i32_0 = arith.constant 0 : i32
    return %arg0, %c0_i32 : i32, i32
  }
}

</mosaic_0001>

<bundles_post_ra>
// kernel: tpu_custom_call.1
= control target key start
LH: loop header
LB: loop body
LE: loop exit
PB: predicated region body
PF: predicated region fallthrough
CT: control target
= control target key end

     0   :  { %8 = vsyncpa [#allocation3], 0  ;;  %s740_s0 = inlined_call_operand.hbm [shape: f32[16,128], index: 0, kind: input, shape index: {}]   ;;  %s741_s1 = inlined_call_operand.hbm [shape: f32[16,128], index: 1, kind: output, shape index: {0}]   ;;  %s742_s2 = inlined_call_operand.hbm [shape: f32[16,128], index: 2, kind: output, shape index: {1}]  }
   0x1   :  { %10 = vsyncpa [#allocation3 + $0x1], 0 }
   0x2   :  { %11 = vsyncpa [#allocation4], 0 }
   0x3   :  { %13 = vsyncpa [#allocation4 + $0x1], 0 }
   0x4   :  { %14 = vsyncpa [#allocation7], 0 }
   0x5   :  { %16 = vsyncpa [#allocation7 + $0x1], 0  ;;  %s545_s9 = smov 0   ;;  %s547_s10 = smov 0  }
   0x6   :  { %s549_s11 = smov 0   ;;  %s551_s12 = smov 0  }
   0x7 LB: > { %s566_s13 = sadd.s32 4294967295, %s525_s12   ;;  %s327_s14 = sadd.s32 4294967294, %s525_s12   ;;  %s525_s12 = sphi %s551_s12, %s757_s12   ;;  %s521_s11 = sphi %s549_s11, %s756_s11   ;;  %s517_s10 = sphi %s547_s10, %s755_s10   ;;  %s513_s9 = sphi %s545_s9, %s754_s9  }
   0x8   : > { %s570_s15 = sadd.s32 1, %s525_s12   ;;  %s29_s16 = sadd.s32 1, %s521_s11 }
   0x9   : > { %s26_s17 = ssub.s32 %s525_s12, %s570_s15  ;;  %p36_p0 = scmp.ne.s32.totalorder %s521_s11, %s517_s10 }
   0xa   : > { %p27_p1 = scmp.eq.s32.totalorder %s26_s17, 0  ;;  %p37_p2 = scmp.eq.s32.totalorder %s525_s12, 0 }
   0xb   : > { %p42_p3 = scmp.ne.s32.totalorder %s517_s10, %s513_s9  ;;  %p43_p4 = scmp.eq.s32.totalorder %s566_s13, 0 }
   0xc   : > { %s582_s18 = scalar_select %p27_p1, %s521_s11, %s29_s16  }
   0xd   : > { %p584_p5 = por %p37_p2, %p36_p0  ;;  %p588_p6 = por %p43_p4, %p42_p3 }
   0xe   : > { %p66_p7 = scmp.eq.s32.totalorder %s566_s13, 1  ;;  %p72_p8 = scmp.eq.s32.totalorder %s327_s14, 1 }
   0xf   : > { %p359_p10 = scmp.lt.s32.totalorder %s525_s12, 2  ;;  %s118_s23 = sand.u32 1, %s521_s11  }
  0x10   : > { %p595_p11 = por %p66_p7, %p36_p0  ;;  %p599_p12 = por %p72_p8, %p42_p3 }
  0x11   : > { %s331_s24 = sshll.u32 %s525_s12, 7  ;;  %s330_s25 = sshll.u32 %s118_s23, 3 }
  0x12   : > { %s746_s21 = scalar_select %p595_p11, 1, 0 }
  0x13   : > { %s747_s22 = scalar_select %p599_p12, 1, 0 }
  0x14   : > { %s608_s28 = scalar_lea.hbm %s740_s0, %s331_s24  ;;  %s122_s29 = scalar_lea.vmem [#allocation2], %s330_s25 }
  0x15   : > { %s129_s30 = sshll.u32 %s122_s29, 4  ;;  %p612_p13 = pnand %p359_p10, %p584_p5  ;;  %s616_s30 = int_to_ptr.vmem [resolvable:$true] %s129_s30 }
  0x16   : > { %s119_s4 = scalar_lea.sflag [#allocation3], %s118_s23  ;;  %s397_s5 = scalar_lea.hbm %s608_s28, 128 }
  0x17   : > { %p398_p2 = scmp.ne.s32.totalorder %s608_s28, %s397_s5  ;;  %p399_p3 = pneg %p612_p13 }
  0x18   : > { %s402_s8 = scalar_lea.hbm %s740_s0, 256  ;;  %p403_p5 = scmp.lt.u32.totalorder %s608_s28, %s740_s0 }
  0x19   : > { %p400_p4 = pnand %p399_p3, %p398_p2  ;;  %p404_p8 = scmp.lt.u32.totalorder %s402_s8, %s397_s5 }
  0x1a   : > { %p406_p9 = scmp.lt.u32.totalorder %s397_s5, %s608_s28 }
  0x1b   : > { %p401_p7 = pneg %p400_p4  ;;  %p405_p10 = por %p404_p8, %p403_p5 }
  0x1d   : > { %p407_p0 = por %p406_p9, %p405_p10 }
  0x1f   : > { %p408_p1 = pnand %p407_p0, %p401_p7 }
  0x21   : > { %411 = shalt.err (!%p408_p1)
}
  0x22   : > { %s412_s17 = scalar_lea.vmem %s616_s30, 128  ;;  %s527_s19 = smov [#allocation2]  }
  0x23   : > { %p413_p2 = scmp.ne.s32.totalorder %s616_s30, %s412_s17  ;;  %s417_s23 = sshll.u32 %s527_s19, 4  ;;  %s418_s23 = int_to_ptr.vmem [resolvable:$false] %s417_s23 }
  0x24   : > { %s419_s24 = scalar_lea.vmem %s418_s23, 256  ;;  %p420_p11 = scmp.lt.s32.totalorder %s616_s30, %s418_s23 }
  0x25   : > { %p415_p4 = pnand %p413_p2, %p399_p3  ;;  %p421_p5 = scmp.lt.s32.totalorder %s419_s24, %s412_s17 }
  0x27   : > { %p416_p12 = pneg %p415_p4  ;;  %p422_p8 = por %p421_p5, %p420_p11 }
  0x29   : > { %p423_p9 = pnand %p422_p8, %p416_p12 }
  0x2b   : > { %426 = shalt.err (!%p423_p9)
}
  0x2c   : > { %351 = dma.hbm_to_vmem [thread:$0]  (!%p612_p13), %s608_s28, 128, %s616_s30, %s119_s4  }
  0x2d   : > { %p749_p0 = scmp.lt.s32.totalorder %s525_s12, 3  ;;  %p750_p1 = scmp.ge.s32.totalorder %s525_s12, 1 }
  0x2f   : > { %p135_p3 = pnand %p750_p1, %p749_p0 }
  0x30   : > { %s650_s25 = sand.u32 (!%p135_p3), 1, %s517_s10  }
  0x31   : > { %138 = sbr.rel (%p135_p3) target bundleno = 131 (0x83), region = 24  ;;  %s653_s26 = sshll.u32 (!%p135_p3), %s650_s25, 3 }
  0x32   : > { %s141_s27 = scalar_lea.sflag (!%p135_p3), [#allocation3], %s650_s25  ;;  %s144_s29 = scalar_lea.vmem (!%p135_p3), [#allocation2], %s653_s26 }
  0x38   : > { %500 = dma.done.wait (%p588_p6), %s141_s27, 128  }
  0x39   : > { %502 = vsyncadd (%p588_p6), %s141_s27, 4294967168  ;;  %v170_v0 = vld [vmem:[%s144_s29] sm:$0xff]  ;;  %s162_s20 = scalar_lea.vmem [#allocation5], %s653_s26  ;;  %s169_s30 = scalar_lea.vmem [#allocation6], %s653_s26 }
  0x3a   : > { %v171_v1 = vand.u32 2147483647, %v170_v0  ;;  %v188_v9 = vsub.f32 0.0, %v170_v0  ;;  %v184_v12 = vmax.f32 %v170_v0, 0.0  ;;  %s212_s28 = sshll.u32 %s162_s20, 4  ;;  %s225_s3 = sshll.u32 %s169_s30, 4  ;;  %s664_s28 = int_to_ptr.vmem [resolvable:$true] %s212_s28  ;;  %s666_s3 = int_to_ptr.vmem [resolvable:$true] %s225_s3 }
  0x3b   : > { %s338_s4 = sshll.u32 %s566_s13, 7  ;;  %vm186_vm1 = vcmp.gt.f32.partialorder %v170_v0, 20.0  ;;  %s199_s16 = scalar_lea.sflag [#allocation7], %s650_s25 }
  0x3c   : > { %v172_v2 = vsub.f32 0.0, %v171_v1  ;;  %v189_v13 = vmax.f32 %v188_v9, 0.0  ;;  %s671_s7 = scalar_lea.hbm %s742_s2, %s338_s4  ;;  %s676_s13 = scalar_lea.hbm %s741_s1, %s338_s4 }
  0x3d   : > { %s427_s17 = scalar_lea.vmem %s666_s3, 128  ;;  %p751_p11 = scmp.ne.s32.totalorder %s746_s21, 0 }
  0x3e   : > { %v173_v3 = vmul.f32 1.442695, %v172_v2  ;;  %p428_p6 = scmp.ne.s32.totalorder %s666_s3, %s427_s17  ;;  %s528_s19 = smov [#allocation6]  }
  0x3f   : > { %s431_s23 = sshll.u32 %s528_s19, 4  ;;  %s432_s23 = int_to_ptr.vmem [resolvable:$false] %s431_s23 }
  0x40   : > { %393 = vpow2.f32 %v173_v3  ;;  %p429_p12 = pnand %p428_p6, %p751_p11  ;;  %s433_s24 = scalar_lea.vmem %s432_s23, 256 }
  0x41   : > { %p434_p7 = scmp.lt.s32.totalorder %s666_s3, %s432_s23  ;;  %p435_p10 = scmp.lt.s32.totalorder %s433_s24, %s427_s17 }
  0x42   : > { %p430_p13 = pneg %p429_p12 }
  0x43   : > { %p436_p2 = por %p435_p10, %p434_p7 }
  0x45   : > { %p437_p4 = pnand %p436_p2, %p430_p13 }
  0x4a   : > { %v394_v4 = vpop.eup %393 }
  0x4b   : > { %v175_v5 = vadd.f32 1.0, %v394_v4  ;;  %v178_v6 = vmul.f32 -0.5, %v394_v4  ;;  %v181_v8 = vand.u32 2147483647, %v394_v4 }
  0x4d   : > { %395 = vlog2.f32 %v175_v5  ;;  %v179_v7 = vadd.f32 1.0, %v178_v6  ;;  %vm182_vm0 = vcmp.lt.f32.partialorder %v181_v8, 0.0004427343 }
  0x4f   : > { %v180_v10 = vmul.f32 %v394_v4, %v179_v7 }
  0x57   : > { %v396_v11 = vpop.eup %395 }
  0x58   : > { %v177_v14 = vmul.f32 0.6931472, %v396_v11 }
  0x5a   : > { %v183_v15 = vsel %vm182_vm0, %v180_v10, %v177_v14 }
  0x5b   : > { %v185_v16 = vadd.f32 %v184_v12, %v183_v15  ;;  %v190_v17 = vadd.f32 %v189_v13, %v183_v15 }
  0x5d   : > { %v187_v18 = vsel %vm186_vm1, %v170_v0, %v185_v16  ;;  %192 = vst [vmem:[%s169_s30] sm:$0xff] %v190_v17 }
  0x5e   : > { %191 = vst [vmem:[%s162_s20] sm:$0xff] %v187_v18 }
  0x5f   : > { %440 = shalt.err (!%p437_p4)
}
  0x60   : > { %s441_s26 = scalar_lea.hbm %s671_s7, 128  ;;  %s445_s20 = scalar_lea.hbm %s742_s2, 256 }
  0x61   : > { %p442_p5 = scmp.ne.s32.totalorder %s671_s7, %s441_s26  ;;  %p446_p0 = scmp.lt.u32.totalorder %s671_s7, %s742_s2 }
  0x62   : > { %p447_p1 = scmp.lt.u32.totalorder %s445_s20, %s441_s26  ;;  %p449_p6 = scmp.lt.u32.totalorder %s441_s26, %s671_s7 }
  0x63   : > { %p443_p8 = pnand %p442_p5, %p751_p11 }
  0x64   : > { %p448_p3 = por %p447_p1, %p446_p0 }
  0x65   : > { %p444_p9 = pneg %p443_p8 }
  0x66   : > { %p450_p12 = por %p449_p6, %p448_p3 }
  0x68   : > { %p451_p13 = pnand %p450_p12, %p444_p9 }
  0x6a   : > { %454 = shalt.err (!%p451_p13)
}
  0x6b   : > { %345 = dma.vmem_to_hbm [thread:$0]  (%p751_p11), %s666_s3, 128, %s671_s7, %s199_s16  }
  0x6c   : > { %s194_s5 = scalar_lea.sflag [#allocation4], %s650_s25  ;;  %s455_s6 = scalar_lea.vmem %s664_s28, 128 }
  0x6d   : > { %p456_p7 = scmp.ne.s32.totalorder %s664_s28, %s455_s6  ;;  %s529_s8 = smov [#allocation5]  }
  0x6e   : > { %s459_s14 = sshll.u32 %s529_s8, 4  ;;  %s460_s14 = int_to_ptr.vmem [resolvable:$false] %s459_s14 }
  0x6f   : > { %p457_p10 = pnand %p456_p7, %p751_p11  ;;  %s461_s17 = scalar_lea.vmem %s460_s14, 256 }
  0x70   : > { %p462_p4 = scmp.lt.s32.totalorder %s664_s28, %s460_s14  ;;  %p463_p5 = scmp.lt.s32.totalorder %s461_s17, %s455_s6 }
  0x71   : > { %p458_p2 = pneg %p457_p10 }
  0x72   : > { %p464_p8 = por %p463_p5, %p462_p4 }
  0x74   : > { %p465_p9 = pnand %p464_p8, %p458_p2 }
  0x76   : > { %468 = shalt.err (!%p465_p9)
}
  0x77   : > { %s469_s25 = scalar_lea.hbm %s676_s13, 128  ;;  %s473_s16 = scalar_lea.hbm %s741_s1, 256 }
  0x78   : > { %p470_p0 = scmp.ne.s32.totalorder %s676_s13, %s469_s25  ;;  %p474_p6 = scmp.lt.u32.totalorder %s676_s13, %s741_s1 }
  0x79   : > { %p475_p12 = scmp.lt.u32.totalorder %s473_s16, %s469_s25  ;;  %p477_p7 = scmp.lt.u32.totalorder %s469_s25, %s676_s13 }
  0x7a   : > { %p471_p1 = pnand %p470_p0, %p751_p11 }
  0x7b   : > { %p476_p13 = por %p475_p12, %p474_p6 }
  0x7c   : > { %p472_p3 = pneg %p471_p1 }
  0x7d   : > { %p478_p10 = por %p477_p7, %p476_p13 }
  0x7f   : > { %p479_p2 = pnand %p478_p10, %p472_p3 }
  0x81   : > { %482 = shalt.err (!%p479_p2)
}
  0x82   : > { %344 = dma.vmem_to_hbm [thread:$0]  (%p751_p11), %s664_s28, 128, %s676_s13, %s194_s5  }
  0x83 PF: > { %s237_s24 = sand.u32 1, %s513_s9   ;;  %p752_p4 = scmp.ne.s32.totalorder %s747_s22, 0 }
  0x84   : > { %p753_p5 = scmp.ge.s32.totalorder %s525_s12, 2  ;;  %s238_s26 = scalar_lea.sflag [#allocation4], %s237_s24 }
  0x86   : > { %p353_p8 = pnand %p753_p5, %p752_p4 }
  0x88   : > { %504 = dma.done.wait (!%p353_p8), %s238_s26, 128  }
  0x89   : > { %506 = vsyncadd (!%p353_p8), %s238_s26, 4294967168  ;;  %s247_s27 = scalar_lea.sflag [#allocation7], %s237_s24 }
  0x8a   : > { %508 = dma.done.wait (!%p353_p8), %s247_s27, 128  }
  0x8b   : > { %510 = vsyncadd (!%p353_p8), %s247_s27, 4294967168  ;;  %p19_p11 = scmp.ge.s32.totalorder %s570_s15, 4   ;;  %s754_s9 = smov %s517_s10 }
  0x8c   : > { %s755_s10 = smov %s521_s11  ;;  %s756_s11 = smov %s582_s18 }
  0x8d   : > { %s757_s12 = smov %s570_s15  ;;  %21 = sbr.rel (!%p19_p11) target bundleno = 7 (0x7), region = 86 }
  0x94   :  { %252 = vsyncpa [#allocation3], 1 }
  0x95   :  { %254 = vsyncpa [#allocation3 + $0x1], 1 }
  0x96   :  { %255 = vsyncpa [#allocation4], 1 }
  0x97   :  { %257 = vsyncpa [#allocation4 + $0x1], 1 }
  0x98   :  { %258 = vsyncpa [#allocation7], 1 }
  0x99   :  { %260 = vsyncpa [#allocation7 + $0x1], 1 }

</bundles_post_ra>
